<compile_context>
chip_gen: v7x
topology: tpu7x:2x2x1
jax: 0.10.0
libtpu: 0.0.40
codegen_flags: <defaults>
</compile_context>

<pallas_src>
import functools

import jax
import jax.numpy as jnp
from jax.experimental import pallas as pl
from jax.experimental.pallas import tpu as pltpu

_OUT_SUBLANES = 8
_OUT_LANES = 128  # moments live in lanes 0..n_moments-1 (row 0) of a lane-dense block


def _cmd_tile_kernel(x1_ref, x2_ref, out_ref, *, n_moments: int, n1: int, n2: int,
                     d: int, td: int, needs_mask: bool, accumulate: bool):
    j = pl.program_id(0)

    # Native-dtype tiles (f32 or bf16); no full f32 copy is materialized.
    x1 = x1_ref[...]
    x2 = x2_ref[...]

    inv_n1 = jnp.float32(1.0 / n1)
    inv_n2 = jnp.float32(1.0 / n2)

    # Batch (sublane) means on the MXU in the input's native dtype.  The ones
    # LHS is exact in any dtype, so bf16 inputs stay on the bf16 MXU path; the
    # 1/n scale is applied to the tiny (1, td) f32 result.
    ones1 = jnp.ones((1, n1), x1.dtype)
    ones2 = jnp.ones((1, n2), x2.dtype)
    mx1 = jnp.dot(ones1, x1, preferred_element_type=jnp.float32) * inv_n1
    mx2 = jnp.dot(ones2, x2, preferred_element_type=jnp.float32) * inv_n2

    # Centering fuses the f32 promotion into the subtract.
    sx1 = x1.astype(jnp.float32) - mx1
    sx2 = x2.astype(jnp.float32) - mx2

    if needs_mask:
        # Ragged feature tail: columns >= d of the last block hold garbage.
        # All compute up to here is column-local, so it is enough to zero the
        # invalid lanes of each (1, td) per-moment difference right before the
        # only cross-column reduction (select, so NaN/Inf garbage is dropped).
        col = j * td + jax.lax.broadcasted_iota(jnp.int32, (1, x1.shape[-1]), 1)
        valid = col < d

        def col_sum_sq(dk):
            return jnp.sum(jnp.where(valid, dk * dk, 0.0))
    else:
        def col_sum_sq(dk):
            return jnp.sum(dk * dk)

    partials = [col_sum_sq(mx1 - mx2)]  # moment "1": squared diff of means

    # Per-moment batch reductions with 1/n folded into an f32-weighted LHS
    # (centered powers are f32 already, so this matmul is on the f32 path).
    w1 = jnp.full((1, n1), inv_n1, jnp.float32)
    w2 = jnp.full((1, n2), inv_n2, jnp.float32)

    # Incremental running powers: p_k = p_{k-1} * sx (one mul/elem/moment).
    p1 = sx1
    p2 = sx2
    for _ in range(n_moments - 1):  # k = 2 .. n_moments (static, unrolled)
        p1 = p1 * sx1
        p2 = p2 * sx2
        ss1 = jnp.dot(w1, p1, preferred_element_type=jnp.float32)
        ss2 = jnp.dot(w2, p2, preferred_element_type=jnp.float32)
        partials.append(col_sum_sq(ss1 - ss2))

    # Scatter the n_moments scalar partials into row 0, lanes 0..n_moments-1 of
    # a lane-dense (8, 128) block; everything else is exactly zero.
    lane = jax.lax.broadcasted_iota(jnp.int32, (_OUT_SUBLANES, _OUT_LANES), 1)
    row = jax.lax.broadcasted_iota(jnp.int32, (_OUT_SUBLANES, _OUT_LANES), 0)
    vec = jnp.zeros((_OUT_SUBLANES, _OUT_LANES), jnp.float32)
    for m, pm in enumerate(partials):
        vec = jnp.where((row == 0) & (lane == m), pm, vec)

    if accumulate:
        # Single-TensorCore schedule: the output block stays resident across
        # the whole grid (constant index_map) and doubles as the accumulator.
        @pl.when(j == 0)
        def _():
            out_ref[...] = jnp.zeros_like(out_ref)

        out_ref[...] += vec

        @pl.when(j == pl.num_programs(0) - 1)
        def _():
            acc = out_ref[...]                    # non-zero only at (0, m<n_moments)
            per_sqrt = jnp.sqrt(acc)              # sqrt(0) = 0 elsewhere
            total = jnp.sum(per_sqrt, axis=1, keepdims=True)
            total = jnp.sum(total, axis=0, keepdims=True)       # (1, 1)
            out_ref[...] = jnp.broadcast_to(total, out_ref.shape)
    else:
        # Multi-TensorCore ("parallel") schedule: per-tile partials, reduced in
        # a tiny JAX epilogue.
        out_ref[...] = vec


def _vmem_capacity_bytes() -> int:
    try:
        return int(pltpu.get_tpu_info().vmem_capacity_bytes)
    except Exception:
        return 64 * 1024 * 1024  # conservative (v7x-sized) fallback


def _has_multiple_tensorcores() -> bool:
    try:
        dev = jax.devices()[0]
        cores = getattr(dev, "num_cores", None)
        if cores is not None and int(cores) > 1:
            return True
        kind = str(getattr(dev, "device_kind", "")).lower()
        return "v7" in kind
    except Exception:
        return False


def _pick_tile_d(n1: int, n2: int, itemsize: int, vmem_limit_bytes: int,
                 d: int, multi_core: bool) -> int:
    # Live bytes per feature column in one grid step:
    #   2x double-buffered native-dtype input rows + f32 centered rows + f32
    #   running-power rows.  Keep ~40% of the scoped limit as headroom for
    #   compiler temporaries; no artificial cap — the VMEM budget is the guard.
    per_col = max((n1 + n2) * (2 * itemsize + 8), 1)
    budget = (vmem_limit_bytes * 3) // 5
    td = (budget // per_col) // 128 * 128
    td = max(td, 128)  # lane-alignment floor (only binds for enormous batches)
    if multi_core and d > 2 * 128:
        # Keep >= 2 tiles so both TensorCores get work on the "parallel" axis.
        half = ((pl.cdiv(d, 2) + 127) // 128) * 128
        td = min(td, max(half, 128))
    return td


def cmd_forward(x1: jax.Array, x2: jax.Array, n_moments: int,
                tile_d=None, multi_core=None) -> jax.Array:
    """Pallas implementation of CMD().forward(x1, x2, n_moments) -> scalar."""
    assert x1.ndim == 2 and x2.ndim == 2 and x1.shape[1] == x2.shape[1]
    assert 1 <= n_moments <= _OUT_LANES
    n1, d = x1.shape
    n2, _ = x2.shape

    if multi_core is None:
        multi_core = _has_multiple_tensorcores()

    cap = _vmem_capacity_bytes()
    vmem_limit = min(cap * 3 // 4, 100 * 1024 * 1024)  # 48 MiB on v7x, 96 MiB on v5e/v6e

    itemsize = max(x1.dtype.itemsize, x2.dtype.itemsize)
    if tile_d is None:
        tile_d = _pick_tile_d(n1, n2, itemsize, vmem_limit, d, multi_core)

    if d <= tile_d:
        td = d            # single tile; block equals full array dims (any d allowed)
        num_tiles = 1
    else:
        td = tile_d       # multiple of 128 by construction
        num_tiles = pl.cdiv(d, td)

    needs_mask = (num_tiles > 1) and (d % td != 0)
    accumulate = not multi_core  # resident accumulator on single-TC chips

    kernel = functools.partial(
        _cmd_tile_kernel, n_moments=n_moments, n1=n1, n2=n2,
        d=d, td=td, needs_mask=needs_mask, accumulate=accumulate)

    out_rows = _OUT_SUBLANES if accumulate else num_tiles * _OUT_SUBLANES
    out_index_map = (lambda j: (0, 0)) if accumulate else (lambda j: (j, 0))
    dim_sem = ("arbitrary",) if accumulate else ("parallel",)

    bytes_in = x1.size * x1.dtype.itemsize + x2.size * x2.dtype.itemsize
    cost = pl.CostEstimate(
        flops=3 * (n1 + n2) * d * n_moments,
        transcendentals=n_moments if accumulate else 0,
        bytes_accessed=bytes_in + out_rows * _OUT_LANES * 4,
    )

    out = pl.pallas_call(
        kernel,
        out_shape=jax.ShapeDtypeStruct((out_rows, _OUT_LANES), jnp.float32),
        grid=(num_tiles,),
        in_specs=[
            pl.BlockSpec((n1, td), lambda j: (0, j)),
            pl.BlockSpec((n2, td), lambda j: (0, j)),
        ],
        out_specs=pl.BlockSpec((_OUT_SUBLANES, _OUT_LANES), out_index_map),
        compiler_params=pltpu.CompilerParams(
            dimension_semantics=dim_sem,
            vmem_limit_bytes=int(vmem_limit),
        ),
        cost_estimate=cost,
    )(x1, x2)

    if accumulate:
        # sqrt-per-moment and final sum already happened in-kernel.
        return out[0, 0]

    # Multi-TC path: sum per-tile partials over feature tiles, then sqrt per
    # moment and sum over moments (tiny epilogue).
    per_moment = jnp.sum(
        out.reshape(num_tiles, _OUT_SUBLANES, _OUT_LANES)[:, 0, :n_moments], axis=0)
    return jnp.sum(jnp.sqrt(per_moment))


def _cmd_reference(x1, x2, n_moments):
    # Pure-JAX reference mirroring the PyTorch module.
    mx1 = jnp.mean(x1, axis=0)
    mx2 = jnp.mean(x2, axis=0)
    sx1 = x1 - mx1
    sx2 = x2 - mx2
    mn = lambda a, b: jnp.sqrt(jnp.sum((a - b) ** 2))
    scms = mn(mx1, mx2)
    for i in range(n_moments - 1):
        k = i + 2
        scms = scms + mn(jnp.mean(sx1 ** k, 0), jnp.mean(sx2 ** k, 0))
    return scms


if __name__ == "__main__":
    key = jax.random.PRNGKey(0)
    k1, k2, k3, k4 = jax.random.split(key, 4)
    n_moments = 5

    # Small hidden-feature shapes consistent with a domain regularizer.
    x1 = jax.random.normal(k1, (8, 32), dtype=jnp.float32)
    x2 = jax.random.normal(k2, (8, 32), dtype=jnp.float32) * 0.8 + 0.1
    out = jax.block_until_ready(cmd_forward(x1, x2, n_moments))
    ref = _cmd_reference(x1, x2, n_moments)
    assert jnp.allclose(out, ref, rtol=1e-4, atol=1e-4), (out, ref)

    # Tiled path with a ragged feature tail (300 = 2*128 + 44): exercises the
    # in-kernel tail mask on both the resident-accumulator (single-TC) and the
    # per-tile-partials ("parallel", v7x-style) schedules.
    y1 = jax.random.normal(k3, (16, 300), dtype=jnp.float32)
    y2 = jax.random.normal(k4, (24, 300), dtype=jnp.float32) * 1.2 - 0.05
    ref2 = _cmd_reference(y1, y2, n_moments)
    out2a = jax.block_until_ready(
        cmd_forward(y1, y2, n_moments, tile_d=128, multi_core=False))
    assert jnp.allclose(out2a, ref2, rtol=1e-4, atol=1e-4), (out2a, ref2)
    out2b = jax.block_until_ready(
        cmd_forward(y1, y2, n_moments, tile_d=128, multi_core=True))
    assert jnp.allclose(out2b, ref2, rtol=1e-4, atol=1e-4), (out2b, ref2)

    # bf16 inputs stay bf16 in HBM and on the MXU mean path (no f32 tile copy).
    z1 = y1.astype(jnp.bfloat16)
    z2 = y2.astype(jnp.bfloat16)
    ref3 = _cmd_reference(z1.astype(jnp.float32), z2.astype(jnp.float32), n_moments)
    out3 = jax.block_until_ready(cmd_forward(z1, z2, n_moments, tile_d=128))
    assert jnp.allclose(out3, ref3, rtol=1e-2, atol=1e-2), (out3, ref3)

    print("KERNEL_OK")
</pallas_src>

<mosaic_0001>
module attributes {stable_mosaic.version = 11 : i64} {
  func.func @_cmd_tile_kernel(%arg0: i32, %arg1: memref<8x32xf32, #tpu.memory_space<vmem>>, %arg2: memref<8x32xf32, #tpu.memory_space<vmem>>, %arg3: memref<8x128xf32, #tpu.memory_space<vmem>>) attributes {dimension_semantics = [#tpu.dimension_semantics<arbitrary>], iteration_bounds = array<i64: 1>, scalar_prefetch = 0 : i64, scratch_operands = 0 : i64, tpu.core_type = #tpu.core_type<tc>, window_params = [{transform_indices = @transform_0, window_bounds = array<i64: 8, 32>}, {transform_indices = @transform_1, window_bounds = array<i64: 8, 32>}, {pipeline_mode = #tpu.pipeline_mode<synchronous>, transform_indices = @transform_2, window_bounds = array<i64: 8, 128>}]} {
    %c0 = arith.constant 0 : index
    %c0_0 = arith.constant 0 : index
    %0 = vector.load %arg1[%c0, %c0_0] : memref<8x32xf32, #tpu.memory_space<vmem>>, vector<8x32xf32>
    %c0_1 = arith.constant 0 : index
    %c0_2 = arith.constant 0 : index
    %1 = vector.load %arg2[%c0_1, %c0_2] : memref<8x32xf32, #tpu.memory_space<vmem>>, vector<8x32xf32>
    %cst = arith.constant 1.000000e+00 : f32
    %2 = vector.broadcast %cst : f32 to vector<1x8xf32>
    %cst_3 = arith.constant 1.000000e+00 : f32
    %3 = vector.broadcast %cst_3 : f32 to vector<1x8xf32>
    %cst_4 = arith.constant dense<0.000000e+00> : vector<1x32xf32>
    %4 = tpu.matmul %2, %0, %cst_4 {dimension_numbers = #tpu.dot_dimension_numbers<[1], [0], [0], [1], [0, 0, 1, 1], [], []>} : vector<1x8xf32>, vector<8x32xf32>, vector<1x32xf32> -> vector<1x32xf32>
    %cst_5 = arith.constant 1.250000e-01 : f32
    %5 = vector.broadcast %cst_5 : f32 to vector<1x32xf32>
    %6 = arith.mulf %4, %5 : vector<1x32xf32>
    %cst_6 = arith.constant dense<0.000000e+00> : vector<1x32xf32>
    %7 = tpu.matmul %3, %1, %cst_6 {dimension_numbers = #tpu.dot_dimension_numbers<[1], [0], [0], [1], [0, 0, 1, 1], [], []>} : vector<1x8xf32>, vector<8x32xf32>, vector<1x32xf32> -> vector<1x32xf32>
    %cst_7 = arith.constant 1.250000e-01 : f32
    %8 = vector.broadcast %cst_7 : f32 to vector<1x32xf32>
    %9 = arith.mulf %7, %8 : vector<1x32xf32>
    %10 = vector.broadcast %6 : vector<1x32xf32> to vector<8x32xf32>
    %11 = arith.subf %0, %10 : vector<8x32xf32>
    %12 = vector.broadcast %9 : vector<1x32xf32> to vector<8x32xf32>
    %13 = arith.subf %1, %12 : vector<8x32xf32>
    %14 = arith.subf %6, %9 : vector<1x32xf32>
    %15 = arith.mulf %14, %14 : vector<1x32xf32>
    %16 = vector.shape_cast %15 : vector<1x32xf32> to vector<1x1x32xf32>
    %cst_8 = arith.constant dense<0.000000e+00> : vector<1xf32>
    %17 = vector.multi_reduction <add>, %16, %cst_8 [1, 2] : vector<1x1x32xf32> to vector<1xf32>
    %18 = vector.shape_cast %17 : vector<1xf32> to vector<1x1x1xf32>
    %19 = vector.extract %18[0, 0, 0] : f32 from vector<1x1x1xf32>
    %cst_9 = arith.constant 1.250000e-01 : f32
    %20 = vector.broadcast %cst_9 : f32 to vector<1x8xf32>
    %cst_10 = arith.constant 1.250000e-01 : f32
    %21 = vector.broadcast %cst_10 : f32 to vector<1x8xf32>
    %22 = arith.mulf %11, %11 : vector<8x32xf32>
    %23 = arith.mulf %13, %13 : vector<8x32xf32>
    %cst_11 = arith.constant dense<0.000000e+00> : vector<1x32xf32>
    %24 = tpu.matmul %20, %22, %cst_11 {dimension_numbers = #tpu.dot_dimension_numbers<[1], [0], [0], [1], [0, 0, 1, 1], [], []>} : vector<1x8xf32>, vector<8x32xf32>, vector<1x32xf32> -> vector<1x32xf32>
    %cst_12 = arith.constant dense<0.000000e+00> : vector<1x32xf32>
    %25 = tpu.matmul %21, %23, %cst_12 {dimension_numbers = #tpu.dot_dimension_numbers<[1], [0], [0], [1], [0, 0, 1, 1], [], []>} : vector<1x8xf32>, vector<8x32xf32>, vector<1x32xf32> -> vector<1x32xf32>
    %26 = arith.subf %24, %25 : vector<1x32xf32>
    %27 = arith.mulf %26, %26 : vector<1x32xf32>
    %28 = vector.shape_cast %27 : vector<1x32xf32> to vector<1x1x32xf32>
    %cst_13 = arith.constant dense<0.000000e+00> : vector<1xf32>
    %29 = vector.multi_reduction <add>, %28, %cst_13 [1, 2] : vector<1x1x32xf32> to vector<1xf32>
    %30 = vector.shape_cast %29 : vector<1xf32> to vector<1x1x1xf32>
    %31 = vector.extract %30[0, 0, 0] : f32 from vector<1x1x1xf32>
    %32 = arith.mulf %22, %11 : vector<8x32xf32>
    %33 = arith.mulf %23, %13 : vector<8x32xf32>
    %cst_14 = arith.constant dense<0.000000e+00> : vector<1x32xf32>
    %34 = tpu.matmul %20, %32, %cst_14 {dimension_numbers = #tpu.dot_dimension_numbers<[1], [0], [0], [1], [0, 0, 1, 1], [], []>} : vector<1x8xf32>, vector<8x32xf32>, vector<1x32xf32> -> vector<1x32xf32>
    %cst_15 = arith.constant dense<0.000000e+00> : vector<1x32xf32>
    %35 = tpu.matmul %21, %33, %cst_15 {dimension_numbers = #tpu.dot_dimension_numbers<[1], [0], [0], [1], [0, 0, 1, 1], [], []>} : vector<1x8xf32>, vector<8x32xf32>, vector<1x32xf32> -> vector<1x32xf32>
    %36 = arith.subf %34, %35 : vector<1x32xf32>
    %37 = arith.mulf %36, %36 : vector<1x32xf32>
    %38 = vector.shape_cast %37 : vector<1x32xf32> to vector<1x1x32xf32>
    %cst_16 = arith.constant dense<0.000000e+00> : vector<1xf32>
    %39 = vector.multi_reduction <add>, %38, %cst_16 [1, 2] : vector<1x1x32xf32> to vector<1xf32>
    %40 = vector.shape_cast %39 : vector<1xf32> to vector<1x1x1xf32>
    %41 = vector.extract %40[0, 0, 0] : f32 from vector<1x1x1xf32>
    %42 = arith.mulf %32, %11 : vector<8x32xf32>
    %43 = arith.mulf %33, %13 : vector<8x32xf32>
    %cst_17 = arith.constant dense<0.000000e+00> : vector<1x32xf32>
    %44 = tpu.matmul %20, %42, %cst_17 {dimension_numbers = #tpu.dot_dimension_numbers<[1], [0], [0], [1], [0, 0, 1, 1], [], []>} : vector<1x8xf32>, vector<8x32xf32>, vector<1x32xf32> -> vector<1x32xf32>
    %cst_18 = arith.constant dense<0.000000e+00> : vector<1x32xf32>
    %45 = tpu.matmul %21, %43, %cst_18 {dimension_numbers = #tpu.dot_dimension_numbers<[1], [0], [0], [1], [0, 0, 1, 1], [], []>} : vector<1x8xf32>, vector<8x32xf32>, vector<1x32xf32> -> vector<1x32xf32>
    %46 = arith.subf %44, %45 : vector<1x32xf32>
    %47 = arith.mulf %46, %46 : vector<1x32xf32>
    %48 = vector.shape_cast %47 : vector<1x32xf32> to vector<1x1x32xf32>
    %cst_19 = arith.constant dense<0.000000e+00> : vector<1xf32>
    %49 = vector.multi_reduction <add>, %48, %cst_19 [1, 2] : vector<1x1x32xf32> to vector<1xf32>
    %50 = vector.shape_cast %49 : vector<1xf32> to vector<1x1x1xf32>
    %51 = vector.extract %50[0, 0, 0] : f32 from vector<1x1x1xf32>
    %52 = arith.mulf %42, %11 : vector<8x32xf32>
    %53 = arith.mulf %43, %13 : vector<8x32xf32>
    %cst_20 = arith.constant dense<0.000000e+00> : vector<1x32xf32>
    %54 = tpu.matmul %20, %52, %cst_20 {dimension_numbers = #tpu.dot_dimension_numbers<[1], [0], [0], [1], [0, 0, 1, 1], [], []>} : vector<1x8xf32>, vector<8x32xf32>, vector<1x32xf32> -> vector<1x32xf32>
    %cst_21 = arith.constant dense<0.000000e+00> : vector<1x32xf32>
    %55 = tpu.matmul %21, %53, %cst_21 {dimension_numbers = #tpu.dot_dimension_numbers<[1], [0], [0], [1], [0, 0, 1, 1], [], []>} : vector<1x8xf32>, vector<8x32xf32>, vector<1x32xf32> -> vector<1x32xf32>
    %56 = arith.subf %54, %55 : vector<1x32xf32>
    %57 = arith.mulf %56, %56 : vector<1x32xf32>
    %58 = vector.shape_cast %57 : vector<1x32xf32> to vector<1x1x32xf32>
    %cst_22 = arith.constant dense<0.000000e+00> : vector<1xf32>
    %59 = vector.multi_reduction <add>, %58, %cst_22 [1, 2] : vector<1x1x32xf32> to vector<1xf32>
    %60 = vector.shape_cast %59 : vector<1xf32> to vector<1x1x1xf32>
    %61 = vector.extract %60[0, 0, 0] : f32 from vector<1x1x1xf32>
    %62 = tpu.iota {dimensions = array<i32: 1>} : vector<8x128xi32>
    %63 = tpu.iota {dimensions = array<i32: 0>} : vector<8x128xi32>
    %cst_23 = arith.constant 0.000000e+00 : f32
    %64 = vector.broadcast %cst_23 : f32 to vector<8x128xf32>
    %c0_i32 = arith.constant 0 : i32
    %65 = vector.broadcast %c0_i32 : i32 to vector<8x128xi32>
    %66 = arith.cmpi eq, %63, %65 : vector<8x128xi32>
    %c0_i32_24 = arith.constant 0 : i32
    %67 = vector.broadcast %c0_i32_24 : i32 to vector<8x128xi32>
    %68 = arith.cmpi eq, %62, %67 : vector<8x128xi32>
    %69 = arith.andi %66, %68 : vector<8x128xi1>
    %70 = vector.broadcast %19 : f32 to vector<8x128xf32>
    %71 = arith.select %69, %70, %64 : vector<8x128xi1>, vector<8x128xf32>
    %c0_i32_25 = arith.constant 0 : i32
    %72 = vector.broadcast %c0_i32_25 : i32 to vector<8x128xi32>
    %73 = arith.cmpi eq, %63, %72 : vector<8x128xi32>
    %c1_i32 = arith.constant 1 : i32
    %74 = vector.broadcast %c1_i32 : i32 to vector<8x128xi32>
    %75 = arith.cmpi eq, %62, %74 : vector<8x128xi32>
    %76 = arith.andi %73, %75 : vector<8x128xi1>
    %77 = vector.broadcast %31 : f32 to vector<8x128xf32>
    %78 = arith.select %76, %77, %71 : vector<8x128xi1>, vector<8x128xf32>
    %c0_i32_26 = arith.constant 0 : i32
    %79 = vector.broadcast %c0_i32_26 : i32 to vector<8x128xi32>
    %80 = arith.cmpi eq, %63, %79 : vector<8x128xi32>
    %c2_i32 = arith.constant 2 : i32
    %81 = vector.broadcast %c2_i32 : i32 to vector<8x128xi32>
    %82 = arith.cmpi eq, %62, %81 : vector<8x128xi32>
    %83 = arith.andi %80, %82 : vector<8x128xi1>
    %84 = vector.broadcast %41 : f32 to vector<8x128xf32>
    %85 = arith.select %83, %84, %78 : vector<8x128xi1>, vector<8x128xf32>
    %c0_i32_27 = arith.constant 0 : i32
    %86 = vector.broadcast %c0_i32_27 : i32 to vector<8x128xi32>
    %87 = arith.cmpi eq, %63, %86 : vector<8x128xi32>
    %c3_i32 = arith.constant 3 : i32
    %88 = vector.broadcast %c3_i32 : i32 to vector<8x128xi32>
    %89 = arith.cmpi eq, %62, %88 : vector<8x128xi32>
    %90 = arith.andi %87, %89 : vector<8x128xi1>
    %91 = vector.broadcast %51 : f32 to vector<8x128xf32>
    %92 = arith.select %90, %91, %85 : vector<8x128xi1>, vector<8x128xf32>
    %c0_i32_28 = arith.constant 0 : i32
    %93 = vector.broadcast %c0_i32_28 : i32 to vector<8x128xi32>
    %94 = arith.cmpi eq, %63, %93 : vector<8x128xi32>
    %c4_i32 = arith.constant 4 : i32
    %95 = vector.broadcast %c4_i32 : i32 to vector<8x128xi32>
    %96 = arith.cmpi eq, %62, %95 : vector<8x128xi32>
    %97 = arith.andi %94, %96 : vector<8x128xi1>
    %98 = vector.broadcast %61 : f32 to vector<8x128xf32>
    %99 = arith.select %97, %98, %92 : vector<8x128xi1>, vector<8x128xf32>
    %c0_i32_29 = arith.constant 0 : i32
    %100 = arith.cmpi eq, %arg0, %c0_i32_29 : i32
    %101 = arith.extui %100 : i1 to i32
    %c0_i32_30 = arith.constant 0 : i32
    %102 = arith.cmpi ne, %101, %c0_i32_30 : i32
    scf.if %102 {
      %cst_37 = arith.constant 0.000000e+00 : f32
      %109 = vector.broadcast %cst_37 : f32 to vector<8x128xf32>
      %c0_38 = arith.constant 0 : index
      %c0_39 = arith.constant 0 : index
      %110 = vector.load %arg3[%c0_38, %c0_39] : memref<8x128xf32, #tpu.memory_space<vmem>>, vector<8x128xf32>
      tpu.vector_store %arg3[%c0_38, %c0_39], %109 {strides = array<i32>} : memref<8x128xf32, #tpu.memory_space<vmem>>, vector<8x128xf32>,
    } else {
    }
    %c0_31 = arith.constant 0 : index
    %c0_32 = arith.constant 0 : index
    %103 = vector.load %arg3[%c0_31, %c0_32] : memref<8x128xf32, #tpu.memory_space<vmem>>, vector<8x128xf32>
    %104 = arith.addf %103, %99 : vector<8x128xf32>
    %c0_33 = arith.constant 0 : index
    %c0_34 = arith.constant 0 : index
    %105 = vector.load %arg3[%c0_33, %c0_34] : memref<8x128xf32, #tpu.memory_space<vmem>>, vector<8x128xf32>
    tpu.vector_store %arg3[%c0_33, %c0_34], %104 {strides = array<i32>} : memref<8x128xf32, #tpu.memory_space<vmem>>, vector<8x128xf32>,
    %c0_i32_35 = arith.constant 0 : i32
    %106 = arith.cmpi eq, %arg0, %c0_i32_35 : i32
    %107 = arith.extui %106 : i1 to i32
    %c0_i32_36 = arith.constant 0 : i32
    %108 = arith.cmpi ne, %107, %c0_i32_36 : i32
    scf.if %108 {
      %c0_37 = arith.constant 0 : index
      %c0_38 = arith.constant 0 : index
      %109 = vector.load %arg3[%c0_37, %c0_38] : memref<8x128xf32, #tpu.memory_space<vmem>>, vector<8x128xf32>
      %110 = math.sqrt %109 : vector<8x128xf32>
      %cst_39 = arith.constant dense<0.000000e+00> : vector<8xf32>
      %111 = vector.multi_reduction <add>, %110, %cst_39 [1] : vector<8x128xf32> to vector<8xf32>
      %112 = vector.shape_cast %111 : vector<8xf32> to vector<8x1xf32>
      %cst_40 = arith.constant dense<0.000000e+00> : vector<1xf32>
      %113 = vector.multi_reduction <add>, %112, %cst_40 [0] : vector<8x1xf32> to vector<1xf32>
      %114 = vector.shape_cast %113 : vector<1xf32> to vector<1x1xf32>
      %115 = vector.shape_cast %114 : vector<1x1xf32> to vector<1x1xf32>
      %116 = vector.broadcast %115 : vector<1x1xf32> to vector<8x128xf32>
      %c0_41 = arith.constant 0 : index
      %c0_42 = arith.constant 0 : index
      %117 = vector.load %arg3[%c0_41, %c0_42] : memref<8x128xf32, #tpu.memory_space<vmem>>, vector<8x128xf32>
      tpu.vector_store %arg3[%c0_41, %c0_42], %116 {strides = array<i32>} : memref<8x128xf32, #tpu.memory_space<vmem>>, vector<8x128xf32>,
    } else {
    }
    return
  }
  func.func @transform_0(%arg0: i32) -> (i32, i32) {
    %c0_i32 = arith.constant 0 : i32
    %c0_i32_0 = arith.constant 0 : i32
    return %c0_i32, %arg0 : i32, i32
  }
  func.func @transform_1(%arg0: i32) -> (i32, i32) {
    %c0_i32 = arith.constant 0 : i32
    %c0_i32_0 = arith.constant 0 : i32
    return %c0_i32, %arg0 : i32, i32
  }
  func.func @transform_2(%arg0: i32) -> (i32, i32) {
    %c0_i32 = arith.constant 0 : i32
    %c0_i32_0 = arith.constant 0 : i32
    %c0_i32_1 = arith.constant 0 : i32
    return %c0_i32, %c0_i32_0 : i32, i32
  }
}

</mosaic_0001>

<bundles_post_ra>
// kernel: tpu_custom_call.1
= control target key start
LH: loop header
LB: loop body
LE: loop exit
PB: predicated region body
PF: predicated region fallthrough
CT: control target
= control target key end

     0   :  { %7 = vsyncpa [#allocation3], 0  ;;  %s1213_s0 = inlined_call_operand.hbm [shape: f32[8,32], index: 0, kind: input, shape index: {}]   ;;  %s1214_s1 = inlined_call_operand.hbm [shape: f32[8,32], index: 1, kind: input, shape index: {}]   ;;  %s1215_s2 = inlined_call_operand.hbm [shape: f32[8,128], index: 2, kind: output, shape index: {}]  }
   0x1   :  { %8 = vsyncpa [#allocation6], 0 }
   0x2   :  { %9 = vsyncpa [#allocation4], 0  ;;  %s1066_s9 = smov [#allocation2]   ;;  %s1067_s11 = smov [#allocation5]  }
   0x3   :  { %s16_s10 = sshll.u32 %s1066_s9, 4  ;;  %s26_s12 = sshll.u32 %s1067_s11, 4  ;;  %s17_s10 = int_to_ptr.vmem [resolvable:$true] %s16_s10  ;;  %s27_s12 = int_to_ptr.vmem [resolvable:$true] %s26_s12 }
   0x4   :  { %s994_s15 = scalar_lea.hbm %s1213_s0, 128 }
   0x5   :  { %p995_p0 = scmp.ne.s32.totalorder %s1213_s0, %s994_s15  ;;  %p998_p1 = scmp.lt.u32.totalorder %s994_s15, %s1213_s0 }
   0x7   :  { %p1000_p2 = pnand %p998_p1, %p995_p0 }
   0x9   :  { %1003 = shalt.err (!%p1000_p2)
}
   0xa   :  { %s1004_s20 = scalar_lea.vmem %s17_s10, 128  ;;  %p1009_p4 = scmp.lt.s32.totalorder %s17_s10, %s17_s10 }
   0xb   :  { %p1005_p3 = scmp.ne.s32.totalorder %s17_s10, %s1004_s20  ;;  %p1010_p5 = scmp.lt.s32.totalorder %s1004_s20, %s1004_s20 }
   0xd   :  { %p1011_p6 = por %p1010_p5, %p1009_p4 }
   0xf   :  { %p1012_p7 = pnand %p1011_p6, %p1005_p3 }
  0x11   :  { %1015 = shalt.err (!%p1012_p7)
}
  0x12   :  { %19 = dma.hbm_to_vmem [thread:$0]  %s1213_s0, 128, %s17_s10, [#allocation3]  }
  0x13   :  { %s1016_s25 = scalar_lea.hbm %s1214_s1, 128 }
  0x14   :  { %p1017_p8 = scmp.ne.s32.totalorder %s1214_s1, %s1016_s25  ;;  %p1020_p9 = scmp.lt.u32.totalorder %s1016_s25, %s1214_s1 }
  0x16   :  { %p1022_p10 = pnand %p1020_p9, %p1017_p8 }
  0x18   :  { %1025 = shalt.err (!%p1022_p10)
}
  0x19   :  { %s1026_s30 = scalar_lea.vmem %s27_s12, 128  ;;  %p1031_p12 = scmp.lt.s32.totalorder %s27_s12, %s27_s12 }
  0x1a   :  { %p1027_p11 = scmp.ne.s32.totalorder %s27_s12, %s1026_s30  ;;  %p1032_p13 = scmp.lt.s32.totalorder %s1026_s30, %s1026_s30 }
  0x1c   :  { %p1033_p0 = por %p1032_p13, %p1031_p12 }
  0x1e   :  { %p1034_p1 = pnand %p1033_p0, %p1027_p11 }
  0x20   :  { %1037 = shalt.err (!%p1034_p1)
}
  0x21   :  { %29 = dma.hbm_to_vmem [thread:$0]  %s1214_s1, 128, %s27_s12, [#allocation6]  }
  0x22   :  { %1060 = dma.done.wait [#allocation3], 128  }
  0x23   :  { %1061 = vsyncadd [#allocation3], 4294967168 }
  0x24   :  { %1062 = dma.done.wait [#allocation6], 128  }
  0x25   :  { %1063 = vsyncadd [#allocation6], 4294967168  ;;  %v1068_v0 = vmov 0.0   ;;  %vm1069_vm0 = vmmov 0   ;;  %vm38_vm1 = vcmask 64512   ;;  %v36_v1 = vld [vmem:[#allocation2] sm:$0xff]  ;;  %v184_v4 = vlaneseq }
  0x26   :  { %925 = vmatprep.subr.mxu0 %v1068_v0  ;;  %930 = vmatprep.subr.mxu1 %v1068_v0  ;;  %v37_v2 = vld [vmem:[#allocation5] sm:$0xff]  ;;  %v1070_v3 = vmov 1.0   ;;  %vm196_vm2 = vcmask 253952   ;;  %v1071_v24 = vmov 0.125   ;;  %s1072_s8 = smov [#allocation7]  }
  0x27   :  { %927 = vmatprep.mubr.msk.f32.mxu0 %vm1069_vm0, %v1068_v0  ;;  %932 = vmatprep.mubr.msk.f32.mxu1 %vm1069_vm0, %v1068_v0  ;;  %v1126_v5 = vshrl.u32 %v184_v4, 7  ;;  %v827_v29 = vand.u32 127, %v184_v4  ;;  %s885_s9 = sshll.u32 %s1072_s8, 4  ;;  %s886_s9 = int_to_ptr.vmem [resolvable:$true] %s885_s9 }
  0x28   :  { %926 = vmatpush3.msra.mxu0 %v36_v1  ;;  %931 = vmatpush3.msra.mxu1 %v37_v2  ;;  %s1038_s10 = scalar_lea.vmem %s886_s9, 128  ;;  %p1043_p3 = scmp.lt.s32.totalorder %s886_s9, %s886_s9 }
  0x29   :  { %928 = vmatmul.mubr.msk.f32.vlgmr.msra.gmra.mrb[0].mxu0 %vm38_vm1, %v1070_v3  ;;  %933 = vmatmul.mubr.msk.f32.vlgmr.msra.gmra.mrb[0].mxu1 %vm38_vm1, %v1070_v3  ;;  %v186_v6 = vsub.s32 0, %v1126_v5  ;;  %vm830_vm3 = vcmp.eq.s32.totalorder %v1126_v5, 0  ;;  %vm831_vm4 = vcmp.eq.s32.totalorder %v827_v29, 0  ;;  %vm835_vm6 = vcmp.eq.s32.totalorder %v827_v29, 1  ;;  %p1039_p2 = scmp.ne.s32.totalorder %s886_s9, %s1038_s10  ;;  %p1044_p4 = scmp.lt.s32.totalorder %s1038_s10, %s1038_s10 }
  0x2a   :  { %935 = vmatprep.subr.mxu0 %v1068_v0  ;;  %940 = vmatprep.subr.mxu1 %v1068_v0  ;;  %vm1159_vm5 = vmand %vm830_vm3, %vm831_vm4  ;;  %vm839_vm8 = vcmp.eq.s32.totalorder %v827_v29, 2  ;;  %vm843_vm10 = vcmp.eq.s32.totalorder %v827_v29, 3  ;;  %vm847_vm12 = vcmp.eq.s32.totalorder %v827_v29, 4 }
  0x2b   :  { %937 = vmatprep.mubr.msk.f32.mxu0 %vm1069_vm0, %v1068_v0  ;;  %942 = vmatprep.mubr.msk.f32.mxu1 %vm1069_vm0, %v1068_v0  ;;  %vm1169_vm7 = vmand %vm830_vm3, %vm835_vm6  ;;  %p1045_p5 = por %p1044_p4, %p1043_p3 }
  0x2c   :  { %vm1175_vm9 = vmand %vm830_vm3, %vm839_vm8 }
  0x2d   :  { %vm1181_vm11 = vmand %vm830_vm3, %vm843_vm10  ;;  %p1046_p6 = pnand %p1045_p5, %p1039_p2 }
  0x2e   :  { %vm1187_vm13 = vmand %vm830_vm3, %vm847_vm12 }
  0xfc   :  { %v108_v7 = vpop.f32.mrb[0].mxu0  ;;  %v179_v8 = vpop.f32.mrb[0].mxu1 }
  0xfd   :  { %v112_v9 = vmul.f32 0.125, %v108_v7  ;;  %v183_v10 = vmul.f32 0.125, %v179_v8  ;;  %v929_v11 = vpop.f32.mrb[1].mxu0  ;;  %v934_v12 = vpop.f32.mrb[1].mxu1 }
  0xff   :  { %v187_v13 = vrot.slane %v112_v9, %v186_v6  ;;  %v192_v14 = vrot.slane %v183_v10, %v186_v6  ;;  %v194_v15 = vsub.f32 %v112_v9, %v183_v10 }
 0x101   :  { %v188_v16 = vsub.f32 %v36_v1, %v187_v13  ;;  %v193_v17 = vsub.f32 %v37_v2, %v192_v14  ;;  %v195_v18 = vmul.f32 %v194_v15, %v194_v15 }
 0x103   :  { %v197_v19 = vsel %vm196_vm2, %v195_v18, 0.0  ;;  %v207_v20 = vmul.f32 %v188_v16, %v188_v16  ;;  %v208_v21 = vmul.f32 %v193_v17, %v193_v17 }
 0x104   :  { %198 = vadd.xlane.f32.xlu0 %v197_v19 }
 0x105   :  { %936 = vmatpush3.msra.mxu0 %v207_v20  ;;  %941 = vmatpush3.msra.mxu1 %v208_v21  ;;  %v364_v22 = vmul.f32 %v207_v20, %v188_v16  ;;  %v365_v23 = vmul.f32 %v208_v21, %v193_v17 }
 0x106   :  { %938 = vmatmul.mubr.msk.f32.vlgmr.msra.gmra.mrb[2].mxu0 %vm38_vm1, %v1071_v24  ;;  %943 = vmatmul.mubr.msk.f32.vlgmr.msra.gmra.mrb[2].mxu1 %vm38_vm1, %v1071_v24 }
 0x107   :  { %945 = vmatprep.subr.mxu0 %v1068_v0  ;;  %950 = vmatprep.subr.mxu1 %v1068_v0  ;;  %v518_v25 = vmul.f32 %v364_v22, %v188_v16  ;;  %v519_v26 = vmul.f32 %v365_v23, %v193_v17 }
 0x108   :  { %946 = vmatpush3.msra.mxu0 %v364_v22  ;;  %951 = vmatpush3.msra.mxu1 %v365_v23 }
 0x109   :  { %947 = vmatprep.mubr.msk.f32.mxu0 %vm1069_vm0, %v1068_v0  ;;  %952 = vmatprep.mubr.msk.f32.mxu1 %vm1069_vm0, %v1068_v0  ;;  %v672_v27 = vmul.f32 %v518_v25, %v188_v16  ;;  %v673_v28 = vmul.f32 %v519_v26, %v193_v17 }
 0x10a   :  { %955 = vmatprep.subr.mxu0 %v1068_v0  ;;  %960 = vmatprep.subr.mxu1 %v1068_v0 }
 0x10b   :  { %948 = vmatmul.mubr.msk.f32.vlgmr.msra.gmra.mrb[4].mxu0 %vm38_vm1, %v1071_v24  ;;  %953 = vmatmul.mubr.msk.f32.vlgmr.msra.gmra.mrb[4].mxu1 %vm38_vm1, %v1071_v24 }
 0x10c   :  { %956 = vmatpush3.msra.mxu0 %v518_v25  ;;  %961 = vmatpush3.msra.mxu1 %v519_v26 }
 0x10d   :  { %957 = vmatprep.mubr.msk.f32.mxu0 %vm1069_vm0, %v1068_v0  ;;  %962 = vmatprep.mubr.msk.f32.mxu1 %vm1069_vm0, %v1068_v0 }
 0x10e   :  { %965 = vmatprep.subr.mxu0 %v1068_v0  ;;  %970 = vmatprep.subr.mxu1 %v1068_v0 }
 0x10f   :  { %958 = vmatmul.mubr.msk.f32.vlgmr.msra.gmra.mrb[6].mxu0 %vm38_vm1, %v1071_v24  ;;  %963 = vmatmul.mubr.msk.f32.vlgmr.msra.gmra.mrb[6].mxu1 %vm38_vm1, %v1071_v24 }
 0x110   :  { %966 = vmatpush3.msra.mxu0 %v672_v27  ;;  %971 = vmatpush3.msra.mxu1 %v673_v28 }
 0x111   :  { %967 = vmatprep.mubr.msk.f32.mxu0 %vm1069_vm0, %v1068_v0  ;;  %972 = vmatprep.mubr.msk.f32.mxu1 %vm1069_vm0, %v1068_v0 }
 0x113   :  { %968 = vmatmul.mubr.msk.f32.vlgmr.msra.gmra.mrb[8].mxu0 %vm38_vm1, %v1071_v24  ;;  %973 = vmatmul.mubr.msk.f32.vlgmr.msra.gmra.mrb[8].mxu1 %vm38_vm1, %v1071_v24 }
 0x191   :  { %v199_v31 = vpop.xlane.xlu0 %198 }
 0x192   :  { %v200_v32 = vrot.slane %v199_v31, 4 }
 0x194   :  { %v201_v33 = vadd.f32 %v200_v32, %v199_v31 }
 0x196   :  { %v202_v34 = vrot.slane %v201_v33, 2 }
 0x198   :  { %v203_v35 = vadd.f32 %v202_v34, %v201_v33 }
 0x19a   :  { %v204_v36 = vrot.slane %v203_v35, 1 }
 0x19c   :  { %v205_v37 = vadd.f32 %v204_v36, %v203_v35 }
 0x19e   :  { %975 = vpush %v205_v37 }
 0x1cf   :  { %s976_s1 = spop %975 }
 0x1d0   :  { %v833_v35 = vstv %s976_s1 }
 0x1d1   :  { %v834_v36 = vsel %vm1159_vm5, %v833_v35, 0.0 }
 0x1d9   :  { %v278_v38 = vpop.f32.mrb[2].mxu0  ;;  %v348_v39 = vpop.f32.mrb[2].mxu1 }
 0x1da   :  { %v352_v40 = vsub.f32 %v278_v38, %v348_v39  ;;  %v939_v41 = vpop.f32.mrb[3].mxu0  ;;  %v944_v42 = vpop.f32.mrb[3].mxu1 }
 0x1dc   :  { %v353_v43 = vmul.f32 %v352_v40, %v352_v40 }
 0x1de   :  { %v432_v44 = vpop.f32.mrb[4].mxu0  ;;  %v502_v45 = vpop.f32.mrb[4].mxu1  ;;  %v354_v46 = vsel %vm196_vm2, %v353_v43, 0.0 }
 0x1df   :  { %v506_v47 = vsub.f32 %v432_v44, %v502_v45  ;;  %355 = vadd.xlane.f32.xlu0 %v354_v46  ;;  %v949_v48 = vpop.f32.mrb[5].mxu0  ;;  %v954_v49 = vpop.f32.mrb[5].mxu1 }
 0x1e1   :  { %v507_v50 = vmul.f32 %v506_v47, %v506_v47 }
 0x1e2   :  { %v586_v51 = vpop.f32.mrb[6].mxu0  ;;  %v656_v52 = vpop.f32.mrb[6].mxu1 }
 0x1e3   :  { %v660_v53 = vsub.f32 %v586_v51, %v656_v52  ;;  %v508_v54 = vsel %vm196_vm2, %v507_v50, 0.0  ;;  %v959_v55 = vpop.f32.mrb[7].mxu0  ;;  %v964_v56 = vpop.f32.mrb[7].mxu1 }
 0x1e4   :  { %509 = vadd.xlane.f32.xlu1 %v508_v54 }
 0x1e5   :  { %v661_v57 = vmul.f32 %v660_v53, %v660_v53 }
 0x1e6   :  { %v740_v58 = vpop.f32.mrb[8].mxu0  ;;  %v810_v59 = vpop.f32.mrb[8].mxu1 }
 0x1e7   :  { %v814_v60 = vsub.f32 %v740_v58, %v810_v59  ;;  %v662_v61 = vsel %vm196_vm2, %v661_v57, 0.0  ;;  %v969_v62 = vpop.f32.mrb[9].mxu0  ;;  %v974_v63 = vpop.f32.mrb[9].mxu1 }
 0x1e8   :  { %663 = vadd.xlane.f32.xlu1 %v662_v61 }
 0x1e9   :  { %v815_v0 = vmul.f32 %v814_v60, %v814_v60 }
 0x1eb   :  { %v816_v1 = vsel %vm196_vm2, %v815_v0, 0.0 }
 0x1ec   :  { %817 = vadd.xlane.f32.xlu0 %v816_v1 }
 0x26c   :  { %v356_v7 = vpop.xlane.xlu0 %355 }
 0x26d   :  { %v357_v8 = vrot.slane %v356_v7, 4 }
 0x26f   :  { %v358_v9 = vadd.f32 %v357_v8, %v356_v7 }
 0x271   :  { %v359_v10 = vrot.slane %v358_v9, 2  ;;  %v510_v11 = vpop.xlane.xlu1 %509 }
 0x272   :  { %v511_v12 = vrot.slane %v510_v11, 4 }
 0x273   :  { %v360_v13 = vadd.f32 %v359_v10, %v358_v9 }
 0x274   :  { %v512_v14 = vadd.f32 %v511_v12, %v510_v11 }
 0x275   :  { %v664_v15 = vpop.xlane.xlu1 %663  ;;  %v361_v16 = vrot.slane %v360_v13, 1 }
 0x276   :  { %v513_v17 = vrot.slane %v512_v14, 2  ;;  %v665_v18 = vrot.slane %v664_v15, 4 }
 0x277   :  { %v362_v19 = vadd.f32 %v361_v16, %v360_v13 }
 0x278   :  { %v666_v20 = vadd.f32 %v665_v18, %v664_v15  ;;  %v514_v21 = vadd.f32 %v513_v17, %v512_v14 }
 0x279   :  { %v818_v5 = vpop.xlane.xlu0 %817  ;;  %977 = vpush %v362_v19 }
 0x27a   :  { %v667_v22 = vrot.slane %v666_v20, 2  ;;  %v819_v23 = vrot.slane %v818_v5, 4  ;;  %v515_v24 = vrot.slane %v514_v21, 1 }
 0x27c   :  { %v820_v25 = vadd.f32 %v819_v23, %v818_v5  ;;  %v516_v26 = vadd.f32 %v515_v24, %v514_v21  ;;  %v668_v27 = vadd.f32 %v667_v22, %v666_v20 }
 0x27e   :  { %v821_v28 = vrot.slane %v820_v25, 2  ;;  %979 = vpush %v516_v26  ;;  %v669_v29 = vrot.slane %v668_v27, 1 }
 0x280   :  { %v822_v31 = vadd.f32 %v821_v28, %v820_v25  ;;  %v670_v32 = vadd.f32 %v669_v29, %v668_v27 }
 0x282   :  { %981 = vpush %v670_v32  ;;  %v823_v33 = vrot.slane %v822_v31, 1 }
 0x284   :  { %v824_v34 = vadd.f32 %v823_v33, %v822_v31 }
 0x286   :  { %983 = vpush %v824_v34 }
 0x2aa   :  { %s978_s4 = spop %977 }
 0x2ab   :  { %v837_v37 = vstv %s978_s4 }
 0x2ac   :  { %v838_v38 = vsel %vm1169_vm7, %v837_v37, %v834_v36 }
 0x2af   :  { %s980_s5 = spop %979 }
 0x2b0   :  { %v841_v39 = vstv %s980_s5 }
 0x2b1   :  { %v842_v40 = vsel %vm1175_vm9, %v841_v39, %v838_v38 }
 0x2b3   :  { %s982_s6 = spop %981 }
 0x2b4   :  { %v845_v41 = vstv %s982_s6 }
 0x2b5   :  { %v846_v42 = vsel %vm1181_vm11, %v845_v41, %v842_v40 }
 0x2b7   :  { %s984_s7 = spop %983 }
 0x2b8   :  { %v849_v43 = vstv %s984_s7 }
 0x2b9   :  { %v850_v30 = vsel %vm1187_vm13, %v849_v43, %v846_v42 }
 0x2ba   :  { %992 = vrsqrt.f32 %v850_v30  ;;  %vm865_vm14 = vcmp.eq.f32.partialorder %v850_v30, inf  ;;  %v868_v46 = vand.u32 2147483648, %v850_v30  ;;  %vm867_vm15 = vcmp.eq.f32.partialorder %v850_v30, 0.0 }
 0x2c4   :  { %v993_v44 = vpop.eup %992 }
 0x2c5   :  { %v864_v45 = vmul.f32 %v993_v44, %v850_v30 }
 0x2c7   :  { %v866_v47 = vsel %vm865_vm14, %v850_v30, %v864_v45 }
 0x2c8   :  { %v869_v48 = vsel %vm867_vm15, %v868_v46, %v866_v47 }
 0x2c9   :  { %870 = vadd.xlane.f32.xlu1 %v869_v48 }
 0x356   :  { %v871_v49 = vpop.xlane.xlu1 %870 }
 0x357   :  { %v872_v50 = vrot.slane %v871_v49, 4 }
 0x359   :  { %v873_v51 = vadd.f32 %v872_v50, %v871_v49 }
 0x35b   :  { %v874_v52 = vrot.slane %v873_v51, 2 }
 0x35d   :  { %v875_v53 = vadd.f32 %v874_v52, %v873_v51 }
 0x35f   :  { %v876_v54 = vrot.slane %v875_v53, 1 }
 0x361   :  { %v877_v55 = vadd.f32 %v876_v54, %v875_v53 }
 0x363   :  { %878 = vst [vmem:[#allocation7] sm:$0xff] %v877_v55 }
 0x364   :  { %1049 = shalt.err (!%p1046_p6)
}
 0x365   :  { %s1050_s13 = scalar_lea.hbm %s1215_s2, 128 }
 0x366   :  { %p1051_p7 = scmp.ne.s32.totalorder %s1215_s2, %s1050_s13  ;;  %p1054_p8 = scmp.lt.u32.totalorder %s1050_s13, %s1215_s2 }
 0x368   :  { %p1056_p9 = pnand %p1054_p8, %p1051_p7 }
 0x36a   :  { %1059 = shalt.err (!%p1056_p9)
}
 0x36b   :  { %888 = dma.vmem_to_hbm [thread:$0]  %s886_s9, 128, %s1215_s2, [#allocation4]  }
 0x36c   :  { %1064 = dma.done.wait [#allocation4], 128  }
 0x36d   :  { %1065 = vsyncadd [#allocation4], 4294967168 }
 0x36e   :  { %892 = vsyncpa [#allocation3], 1 }
 0x36f   :  { %893 = vsyncpa [#allocation6], 1 }
 0x370   :  { %894 = vsyncpa [#allocation4], 1 }

</bundles_post_ra>
